<compile_context>
chip_gen: v6e
topology: v6e:2x2x1
jax: 0.10.0
libtpu: 0.0.40
codegen_flags: <defaults>
</compile_context>

<pallas_src>
import functools

import jax
import jax.numpy as jnp
from jax.experimental import pallas as pl
from jax.experimental.pallas import tpu as pltpu

KSIZE = 5          # depthwise kernel size ([1, 5] conv)
PAD = (KSIZE - 1) // 2
BN_EPS = 1e-5


def inverted_residual_kernel(x_ref, w1_ref, b1_ref, wd_ref, bd_ref,
                             w2_ref, b2_ref, o_ref, h_scr):
    """One (W, TILE_R, Cin) activation tile of the InvertedResidual block.

    x_ref : activations (act dtype), layout (W, TILE_R, Cin) -- no width halo.
    w1/w2 : BN-scale-folded 1x1 conv weights (Cin, Hp) / (Hp, Cout), in the MXU
            operand dtype.  wd: (KSIZE, Hp) f32 depthwise taps (scale folded).
    b*    : folded BN biases, f32.   o_ref: (W, TILE_R, Cout) act dtype.
    h_scr : (W + 2*PAD, TILE_R, Hc) f32 depthwise scratch; the hidden dim is
            processed in Hc-wide chunks (Hp = num_chunks * Hc, zero-padded in
            the wrapper) so tile_r can grow inside the VMEM budget.
    """
    w, tr, c_in = x_ref.shape
    hc = h_scr.shape[-1]
    hidden_pad = w1_ref.shape[1]
    c_out = w2_ref.shape[1]
    num_chunks = hidden_pad // hc
    mxu = w1_ref.dtype

    # Zero the width-halo slabs of the scratch every grid step: the depthwise
    # conv's zero padding is realized purely by these slabs (no in-kernel iota
    # mask, no padded matmul rows).  Re-zeroing each step keeps the kernel
    # correct if the "parallel" grid axis is split across TensorCores.
    zero_halo = jnp.zeros((PAD, tr, hc), jnp.float32)
    h_scr[0:PAD] = zero_halo
    h_scr[PAD + w:PAD + w + PAD] = zero_halo

    # Expand-matmul LHS: (W*TILE_R, Cin), cast once to the MXU operand dtype
    # (a no-op when activations already ship as bf16).
    x2d = x_ref[...].reshape(w * tr, c_in).astype(mxu)

    acc = None                          # f32 (W*TILE_R, Cout) project accumulator
    for c in range(num_chunks):         # static unroll over hidden chunks
        lo = c * hc
        w1c = w1_ref[:, lo:lo + hc]     # (Cin, Hc)   MXU operand
        w2c = w2_ref[lo:lo + hc, :]     # (Hc, Cout)  MXU operand
        b1c = b1_ref[:, lo:lo + hc]     # (1, Hc)     f32
        bdc = bd_ref[:, lo:lo + hc]     # (1, Hc)     f32
        wdc = wd_ref[:, lo:lo + hc]     # (KSIZE, Hc) f32

        # --- expand: 1x1 conv (MXU) + folded-BN bias + ReLU, interior rows only.
        h = jnp.dot(x2d, w1c, preferred_element_type=jnp.float32)
        h = jnp.maximum(h + b1c, 0.0)
        h_scr[PAD:PAD + w] = h.reshape(w, tr, hc)

        # --- depthwise [1,5] conv along W (BN scale folded into taps) + bias
        # + ReLU.  W is the leading (non-vreg) axis, so every tap is a plain
        # slab slice of the zero-haloed scratch: pure re-addressing, no
        # concatenate, no relayout.  Kept f32 (accumulation precision; v5e has
        # no bf16 VPU).
        dw = h_scr[0:w] * wdc[0]
        for k in range(1, KSIZE):       # static unroll, VPU mul/add
            dw = dw + h_scr[k:k + w] * wdc[k]
        h2 = jnp.maximum(dw + bdc, 0.0)                      # (W, TILE_R, Hc)

        # --- project: 1x1 conv, accumulate this Hc slice of the contraction.
        p = jnp.dot(h2.reshape(w * tr, hc).astype(mxu), w2c,
                    preferred_element_type=jnp.float32)
        acc = p if acc is None else acc + p

    y = (acc + b2_ref[...]).reshape(w, tr, c_out)
    # Residual add (use_res branch) in f32; the input tile is re-read here so
    # its value is not held live across the matmuls and depthwise chain.
    o_ref[...] = (x_ref[...].astype(jnp.float32) + y).astype(o_ref.dtype)


def fold_bn(gamma, beta, mean, var):
    scale = gamma / jnp.sqrt(var + BN_EPS)
    bias = beta - mean * scale
    return scale.astype(jnp.float32), bias.astype(jnp.float32)


def _round_up(x, m):
    return ((x + m - 1) // m) * m


def _tpu_vmem_capacity_bytes():
    """Physical per-core VMEM, with a conservative (v7x-like) fallback."""
    try:
        return int(pltpu.get_tpu_info().vmem_capacity_bytes)
    except Exception:
        return 64 * 1024 * 1024


def _pick_hidden_chunk(hidden):
    """Hidden-dim chunk width for the in-kernel expand->dw->project loop.
    Bounds the (W+2*PAD, tile_r, Hc) scratch so tile_r can grow; lane-aligned
    (multiple of 128) whenever hidden is large enough."""
    if hidden <= 512:
        return hidden                   # single chunk, no padding
    for hc in (512, 384, 256, 128):
        if hidden % hc == 0:
            return hc
    return 256                          # hidden gets zero-padded to a multiple


def _pick_tile_r(w, c_in, c_out, hc, r_total, act_bytes, budget_bytes, in_buffers):
    """Largest multiple-of-8 R tile whose per-step working set fits the budget."""
    wp = w + 2 * PAD
    per_row = act_bytes * (in_buffers * w * c_in + 2 * w * c_out)  # pipelined DMA tiles
    per_row += 4 * wp * hc              # f32 depthwise scratch (halo included)
    per_row += 4 * 3 * w * hc           # expand result / dw acc / h2 temporaries
    per_row += 4 * w * c_out            # f32 project accumulator
    tile = budget_bytes // max(per_row, 1)
    tile = min(tile, 1024, _round_up(r_total, 8))
    return max(8, (tile // 8) * 8)


def inverted_residual_wrc(x_wrc, params, *, tile_r=None,
                          mxu_dtype=jnp.bfloat16, act_dtype=jnp.bfloat16,
                          in_buffers=2):
    """InvertedResidual forward on channels-last, W-leading activations.

    x_wrc: (W, R, C) with R = N*H.  Returns (W, R, C) in act_dtype.  Chaining
    consecutive blocks through this entry point avoids the NCHW transposes.
    """
    W, R, C = x_wrc.shape
    w1, bn1, wd, bnd, w2, bn2 = params
    hidden = w1.shape[0]
    c_out = w2.shape[0]
    # TODO(synk): only the use_res branch (stride==1, n_in==n_out,
    # expand_ratio != 1) of the module is implemented here.
    assert c_out == C, "residual path requires n_out == n_in"

    s1, b1 = fold_bn(*bn1)
    sd, bd = fold_bn(*bnd)
    s2, b2 = fold_bn(*bn2)

    # Fold BN scales into the conv weights; only the biases go into the kernel.
    # (Folding into bf16 weights quantizes the scale too; pass
    # mxu_dtype=jnp.float32 for bit-tighter accuracy.)
    w1f = jnp.transpose(w1, (1, 0)) * s1[None, :]        # (Cin, hidden) f32
    w2f = jnp.transpose(w2, (1, 0)) * s2[None, :]        # (hidden, Cout) f32
    wdf = (wd * sd[None, :]).astype(jnp.float32)         # (KSIZE, hidden) f32

    # Hidden chunking (+ zero padding so hidden_pad % Hc == 0; padded channels
    # have zero weights/biases and contribute exactly nothing).
    hc = _pick_hidden_chunk(hidden)
    hidden_pad = _round_up(hidden, hc)
    dh = hidden_pad - hidden
    if dh:
        w1f = jnp.pad(w1f, ((0, 0), (0, dh)))
        w2f = jnp.pad(w2f, ((0, dh), (0, 0)))
        wdf = jnp.pad(wdf, ((0, 0), (0, dh)))
        b1 = jnp.pad(b1, ((0, dh),))
        bd = jnp.pad(bd, ((0, dh),))
    w1f = w1f.astype(mxu_dtype)
    w2f = w2f.astype(mxu_dtype)

    # Generation-aware VMEM sizing (128 MiB v5e/v6e vs 64 MiB v7x).
    cap = _tpu_vmem_capacity_bytes()
    vmem_limit = int(min(100 * 2**20, max(32 * 2**20, 0.75 * cap)))
    if tile_r is None:
        budget = max(6 * 2**20, int(0.30 * cap))
        wbytes = 2 * ((C * hidden_pad + hidden_pad * c_out)
                      * jnp.dtype(mxu_dtype).itemsize
                      + 4 * ((KSIZE + 2) * hidden_pad + c_out))
        budget = max(budget - wbytes, 2 * 2**20)
        tile_r = _pick_tile_r(W, C, c_out, hc, R,
                              jnp.dtype(act_dtype).itemsize, budget, in_buffers)
    tile_r = max(8, (int(tile_r) // 8) * 8)
    r_pad = _round_up(R, tile_r)

    # Activations cross the pallas_call boundary in act_dtype (bf16 default:
    # half the HBM traffic and half the double-buffered DMA-tile VMEM).
    x_in = x_wrc.astype(act_dtype)
    if r_pad != R:
        x_in = jnp.pad(x_in, ((0, 0), (0, r_pad - R), (0, 0)))

    if in_buffers == 2:
        act_spec = pl.BlockSpec((W, tile_r, C), lambda i: (0, i, 0))
    else:
        # Optional deeper input pipeline if a profile shows exposed DMA.
        act_spec = pl.BlockSpec((W, tile_r, C), lambda i: (0, i, 0),
                                pipeline_mode=pl.Buffered(in_buffers))

    out = pl.pallas_call(
        inverted_residual_kernel,
        out_shape=jax.ShapeDtypeStruct((W, r_pad, C), act_dtype),
        grid=(r_pad // tile_r,),
        in_specs=[
            act_spec,                                            # activation tile (pipelined)
            pl.BlockSpec((C, hidden_pad), lambda i: (0, 0)),     # w1  (VMEM-resident)
            pl.BlockSpec((1, hidden_pad), lambda i: (0, 0)),     # b1
            pl.BlockSpec((KSIZE, hidden_pad), lambda i: (0, 0)), # depthwise taps
            pl.BlockSpec((1, hidden_pad), lambda i: (0, 0)),     # bd
            pl.BlockSpec((hidden_pad, c_out), lambda i: (0, 0)), # w2  (VMEM-resident)
            pl.BlockSpec((1, c_out), lambda i: (0, 0)),          # b2
        ],
        # NOTE: Cout < 128 means masked stores here; fusing project with the
        # next block's expand (or a lane-dense output relayout) is the fix.
        out_specs=pl.BlockSpec((W, tile_r, C), lambda i: (0, i, 0)),
        scratch_shapes=[pltpu.VMEM((W + 2 * PAD, tile_r, hc), jnp.float32)],
        compiler_params=pltpu.CompilerParams(
            # TODO(synk): verify the single "parallel" axis splits across both
            # v7x TensorCores; switch to pltpu.CORE_PARALLEL if it does not.
            dimension_semantics=("parallel",),
            vmem_limit_bytes=vmem_limit,
        ),
    )(x_in, w1f, b1.reshape(1, hidden_pad), wdf, bd.reshape(1, hidden_pad),
      w2f, b2.reshape(1, c_out))

    return out[:, :R, :]                # drop R-remainder padding


@functools.partial(jax.jit,
                   static_argnames=("tile_r", "mxu_dtype", "act_dtype", "in_buffers"))
def inverted_residual(x_nchw, params, *, tile_r=None,
                      mxu_dtype=jnp.bfloat16, act_dtype=jnp.bfloat16,
                      in_buffers=2):
    """InvertedResidual forward. x_nchw: (N, C, H, W) -> (N, C, H, W).

    The NCHW <-> (W, N*H, C) transposes below are full-tensor HBM passes done
    by XLA; chain consecutive blocks through inverted_residual_wrc to drop them.
    """
    N, C, H, W = x_nchw.shape
    x_wrc = jnp.transpose(x_nchw, (3, 0, 2, 1)).reshape(W, N * H, C)
    out = inverted_residual_wrc(x_wrc, params, tile_r=tile_r,
                                mxu_dtype=mxu_dtype, act_dtype=act_dtype,
                                in_buffers=in_buffers)
    out = jnp.transpose(out.reshape(W, N, H, C), (1, 3, 2, 0))
    return out.astype(x_nchw.dtype)


def reference_forward(x_nchw, params):
    """Pure-JAX NCHW reference matching the PyTorch module (BN in eval mode)."""
    w1, bn1, wd, bnd, w2, bn2 = params
    s1, b1 = fold_bn(*bn1)
    sd, bd = fold_bn(*bnd)
    s2, b2 = fold_bn(*bn2)
    W = x_nchw.shape[-1]

    h = jnp.einsum('nchw,oc->nohw', x_nchw, w1)
    h = jnp.maximum(h * s1[None, :, None, None] + b1[None, :, None, None], 0.0)

    hp = jnp.pad(h, ((0, 0), (0, 0), (0, 0), (PAD, PAD)))
    acc = jnp.zeros_like(h)
    for k in range(KSIZE):
        acc = acc + hp[..., k:k + W] * wd[k][None, :, None, None]
    h2 = jnp.maximum(acc * sd[None, :, None, None] + bd[None, :, None, None], 0.0)

    h3 = jnp.einsum('nchw,oc->nohw', h2, w2)
    h3 = h3 * s2[None, :, None, None] + b2[None, :, None, None]
    return x_nchw + h3


def make_params(key, n_in, n_out, expand_ratio):
    hidden = int(round(n_in * expand_ratio))
    ks = jax.random.split(key, 15)
    w1 = jax.random.normal(ks[0], (hidden, n_in), jnp.float32) * 0.2     # 1x1 expand (O, I)
    wd = jax.random.normal(ks[1], (KSIZE, hidden), jnp.float32) * 0.2    # depthwise taps (k, C)
    w2 = jax.random.normal(ks[2], (n_out, hidden), jnp.float32) * 0.2    # 1x1 project (O, I)

    def bn(keys, c):
        kg, kb, km, kv = keys
        gamma = 1.0 + 0.1 * jax.random.normal(kg, (c,), jnp.float32)
        beta = 0.1 * jax.random.normal(kb, (c,), jnp.float32)
        mean = 0.1 * jax.random.normal(km, (c,), jnp.float32)
        var = jnp.abs(jax.random.normal(kv, (c,), jnp.float32)) + 0.5
        return (gamma, beta, mean, var)

    bn1 = bn(ks[3:7], hidden)
    bnd = bn(ks[7:11], hidden)
    bn2 = bn(ks[11:15], n_out)
    return (w1, bn1, wd, bnd, w2, bn2)


if __name__ == "__main__":
    # InvertedResidual(n_in=4, n_out=4, stride=1, expand_ratio=4) -> hidden=16, use_res=True
    N, C, H, W = 2, 4, 16, 16
    key = jax.random.PRNGKey(0)
    kx, kp = jax.random.split(key)
    x = jax.random.normal(kx, (N, C, H, W), jnp.float32)
    params = make_params(kp, n_in=C, n_out=C, expand_ratio=4)

    ref = reference_forward(x, params)

    # Exact-semantics path (f32 MXU operands and f32 boundary activations);
    # tile_r=8 -> grid=(4,) so the tiled/pipelined path is actually exercised.
    out = inverted_residual(x, params, tile_r=8,
                            mxu_dtype=jnp.float32, act_dtype=jnp.float32)
    out = jax.block_until_ready(out)
    assert out.shape == (N, C, H, W)
    assert jnp.allclose(out, ref, atol=1e-4, rtol=1e-4), "f32 kernel mismatch vs reference"

    # Performance-default path: bf16 boundary activations + bf16 MXU operands
    # (accumulation / bias / ReLU / depthwise / residual stay f32).
    out_bf16 = inverted_residual(x, params, tile_r=8)
    out_bf16 = jax.block_until_ready(out_bf16)
    assert jnp.allclose(out_bf16, ref, atol=1e-1, rtol=1e-1), "bf16 kernel mismatch vs reference"

    # Auto tile_r via the generation-aware VMEM budget (single grid step here).
    out_auto = inverted_residual(x, params)
    out_auto = jax.block_until_ready(out_auto)
    assert jnp.allclose(out_auto, ref, atol=1e-1, rtol=1e-1), "auto-tile kernel mismatch"

    print("KERNEL_OK")
</pallas_src>

<mosaic_0001>
module attributes {stable_mosaic.version = 11 : i64} {
  func.func @inverted_residual_kernel(%arg0: i32, %arg1: memref<16x8x4xf32, #tpu.memory_space<vmem>>, %arg2: memref<4x16xf32, #tpu.memory_space<vmem>>, %arg3: memref<1x16xf32, #tpu.memory_space<vmem>>, %arg4: memref<5x16xf32, #tpu.memory_space<vmem>>, %arg5: memref<1x16xf32, #tpu.memory_space<vmem>>, %arg6: memref<16x4xf32, #tpu.memory_space<vmem>>, %arg7: memref<1x4xf32, #tpu.memory_space<vmem>>, %arg8: memref<16x8x4xf32, #tpu.memory_space<vmem>>, %arg9: memref<20x8x16xf32, #tpu.memory_space<vmem>>) attributes {dimension_semantics = [#tpu.dimension_semantics<parallel>], iteration_bounds = array<i64: 4>, scalar_prefetch = 0 : i64, scratch_operands = 1 : i64, tpu.core_type = #tpu.core_type<tc>, window_params = [{transform_indices = @transform_0, window_bounds = array<i64: 16, 8, 4>}, {pipeline_mode = #tpu.pipeline_mode<synchronous>, transform_indices = @transform_1, window_bounds = array<i64: 4, 16>}, {pipeline_mode = #tpu.pipeline_mode<synchronous>, transform_indices = @transform_2, window_bounds = array<i64: 1, 16>}, {pipeline_mode = #tpu.pipeline_mode<synchronous>, transform_indices = @transform_3, window_bounds = array<i64: 5, 16>}, {pipeline_mode = #tpu.pipeline_mode<synchronous>, transform_indices = @transform_4, window_bounds = array<i64: 1, 16>}, {pipeline_mode = #tpu.pipeline_mode<synchronous>, transform_indices = @transform_5, window_bounds = array<i64: 16, 4>}, {pipeline_mode = #tpu.pipeline_mode<synchronous>, transform_indices = @transform_6, window_bounds = array<i64: 1, 4>}, {transform_indices = @transform_7, window_bounds = array<i64: 16, 8, 4>}]} {
    %cst = arith.constant 0.000000e+00 : f32
    %0 = vector.broadcast %cst : f32 to vector<2x8x16xf32>
    %c0 = arith.constant 0 : index
    %c0_0 = arith.constant 0 : index
    %c0_1 = arith.constant 0 : index
    %1 = vector.load %arg9[%c0, %c0_0, %c0_1] : memref<20x8x16xf32, #tpu.memory_space<vmem>>, vector<2x8x16xf32>
    tpu.vector_store %arg9[%c0, %c0_0, %c0_1], %0 {strides = array<i32>} : memref<20x8x16xf32, #tpu.memory_space<vmem>>, vector<2x8x16xf32>,
    %c18 = arith.constant 18 : index
    %c0_2 = arith.constant 0 : index
    %c0_3 = arith.constant 0 : index
    %2 = vector.load %arg9[%c18, %c0_2, %c0_3] : memref<20x8x16xf32, #tpu.memory_space<vmem>>, vector<2x8x16xf32>
    tpu.vector_store %arg9[%c18, %c0_2, %c0_3], %0 {strides = array<i32>} : memref<20x8x16xf32, #tpu.memory_space<vmem>>, vector<2x8x16xf32>,
    %c0_4 = arith.constant 0 : index
    %c0_5 = arith.constant 0 : index
    %c0_6 = arith.constant 0 : index
    %3 = vector.load %arg1[%c0_4, %c0_5, %c0_6] : memref<16x8x4xf32, #tpu.memory_space<vmem>>, vector<16x8x4xf32>
    %4 = vector.shape_cast %3 : vector<16x8x4xf32> to vector<128x4xf32>
    %c0_7 = arith.constant 0 : index
    %c0_8 = arith.constant 0 : index
    %5 = vector.load %arg2[%c0_7, %c0_8] : memref<4x16xf32, #tpu.memory_space<vmem>>, vector<4x16xf32>
    %c0_9 = arith.constant 0 : index
    %c0_10 = arith.constant 0 : index
    %6 = vector.load %arg6[%c0_9, %c0_10] : memref<16x4xf32, #tpu.memory_space<vmem>>, vector<16x4xf32>
    %c0_11 = arith.constant 0 : index
    %c0_12 = arith.constant 0 : index
    %7 = vector.load %arg3[%c0_11, %c0_12] : memref<1x16xf32, #tpu.memory_space<vmem>>, vector<1x16xf32>
    %c0_13 = arith.constant 0 : index
    %c0_14 = arith.constant 0 : index
    %8 = vector.load %arg5[%c0_13, %c0_14] : memref<1x16xf32, #tpu.memory_space<vmem>>, vector<1x16xf32>
    %c0_15 = arith.constant 0 : index
    %c0_16 = arith.constant 0 : index
    %9 = vector.load %arg4[%c0_15, %c0_16] : memref<5x16xf32, #tpu.memory_space<vmem>>, vector<5x16xf32>
    %cst_17 = arith.constant dense<0.000000e+00> : vector<128x16xf32>
    %10 = tpu.matmul %4, %5, %cst_17 {dimension_numbers = #tpu.dot_dimension_numbers<[1], [0], [0], [1], [0, 0, 1, 1], [], []>} : vector<128x4xf32>, vector<4x16xf32>, vector<128x16xf32> -> vector<128x16xf32>
    %11 = vector.broadcast %7 : vector<1x16xf32> to vector<128x16xf32>
    %12 = arith.addf %10, %11 : vector<128x16xf32>
    %cst_18 = arith.constant 0.000000e+00 : f32
    %13 = vector.broadcast %cst_18 : f32 to vector<128x16xf32>
    %14 = arith.maximumf %12, %13 : vector<128x16xf32>
    %15 = vector.shape_cast %14 : vector<128x16xf32> to vector<16x8x16xf32>
    %c2 = arith.constant 2 : index
    %c0_19 = arith.constant 0 : index
    %c0_20 = arith.constant 0 : index
    %16 = vector.load %arg9[%c2, %c0_19, %c0_20] : memref<20x8x16xf32, #tpu.memory_space<vmem>>, vector<16x8x16xf32>
    tpu.vector_store %arg9[%c2, %c0_19, %c0_20], %15 {strides = array<i32>} : memref<20x8x16xf32, #tpu.memory_space<vmem>>, vector<16x8x16xf32>,
    %c0_21 = arith.constant 0 : index
    %c0_22 = arith.constant 0 : index
    %c0_23 = arith.constant 0 : index
    %17 = vector.load %arg9[%c0_21, %c0_22, %c0_23] : memref<20x8x16xf32, #tpu.memory_space<vmem>>, vector<16x8x16xf32>
    %18 = vector.extract_strided_slice %9 {offsets = [0, 0], sizes = [1, 16], strides = [1, 1]} : vector<5x16xf32> to vector<1x16xf32>
    %19 = vector.shape_cast %18 : vector<1x16xf32> to vector<16xf32>
    %20 = vector.shape_cast %19 : vector<16xf32> to vector<1x1x16xf32>
    %21 = vector.broadcast %20 : vector<1x1x16xf32> to vector<16x8x16xf32>
    %22 = arith.mulf %17, %21 : vector<16x8x16xf32>
    %c1 = arith.constant 1 : index
    %c0_24 = arith.constant 0 : index
    %c0_25 = arith.constant 0 : index
    %23 = vector.load %arg9[%c1, %c0_24, %c0_25] : memref<20x8x16xf32, #tpu.memory_space<vmem>>, vector<16x8x16xf32>
    %24 = vector.extract_strided_slice %9 {offsets = [1, 0], sizes = [1, 16], strides = [1, 1]} : vector<5x16xf32> to vector<1x16xf32>
    %25 = vector.shape_cast %24 : vector<1x16xf32> to vector<16xf32>
    %26 = vector.shape_cast %25 : vector<16xf32> to vector<1x1x16xf32>
    %27 = vector.broadcast %26 : vector<1x1x16xf32> to vector<16x8x16xf32>
    %28 = arith.mulf %23, %27 : vector<16x8x16xf32>
    %29 = arith.addf %22, %28 : vector<16x8x16xf32>
    %c2_26 = arith.constant 2 : index
    %c0_27 = arith.constant 0 : index
    %c0_28 = arith.constant 0 : index
    %30 = vector.load %arg9[%c2_26, %c0_27, %c0_28] : memref<20x8x16xf32, #tpu.memory_space<vmem>>, vector<16x8x16xf32>
    %31 = vector.extract_strided_slice %9 {offsets = [2, 0], sizes = [1, 16], strides = [1, 1]} : vector<5x16xf32> to vector<1x16xf32>
    %32 = vector.shape_cast %31 : vector<1x16xf32> to vector<16xf32>
    %33 = vector.shape_cast %32 : vector<16xf32> to vector<1x1x16xf32>
    %34 = vector.broadcast %33 : vector<1x1x16xf32> to vector<16x8x16xf32>
    %35 = arith.mulf %30, %34 : vector<16x8x16xf32>
    %36 = arith.addf %29, %35 : vector<16x8x16xf32>
    %c3 = arith.constant 3 : index
    %c0_29 = arith.constant 0 : index
    %c0_30 = arith.constant 0 : index
    %37 = vector.load %arg9[%c3, %c0_29, %c0_30] : memref<20x8x16xf32, #tpu.memory_space<vmem>>, vector<16x8x16xf32>
    %38 = vector.extract_strided_slice %9 {offsets = [3, 0], sizes = [1, 16], strides = [1, 1]} : vector<5x16xf32> to vector<1x16xf32>
    %39 = vector.shape_cast %38 : vector<1x16xf32> to vector<16xf32>
    %40 = vector.shape_cast %39 : vector<16xf32> to vector<1x1x16xf32>
    %41 = vector.broadcast %40 : vector<1x1x16xf32> to vector<16x8x16xf32>
    %42 = arith.mulf %37, %41 : vector<16x8x16xf32>
    %43 = arith.addf %36, %42 : vector<16x8x16xf32>
    %c4 = arith.constant 4 : index
    %c0_31 = arith.constant 0 : index
    %c0_32 = arith.constant 0 : index
    %44 = vector.load %arg9[%c4, %c0_31, %c0_32] : memref<20x8x16xf32, #tpu.memory_space<vmem>>, vector<16x8x16xf32>
    %45 = vector.extract_strided_slice %9 {offsets = [4, 0], sizes = [1, 16], strides = [1, 1]} : vector<5x16xf32> to vector<1x16xf32>
    %46 = vector.shape_cast %45 : vector<1x16xf32> to vector<16xf32>
    %47 = vector.shape_cast %46 : vector<16xf32> to vector<1x1x16xf32>
    %48 = vector.broadcast %47 : vector<1x1x16xf32> to vector<16x8x16xf32>
    %49 = arith.mulf %44, %48 : vector<16x8x16xf32>
    %50 = arith.addf %43, %49 : vector<16x8x16xf32>
    %51 = vector.shape_cast %8 : vector<1x16xf32> to vector<1x1x16xf32>
    %52 = vector.broadcast %51 : vector<1x1x16xf32> to vector<16x8x16xf32>
    %53 = arith.addf %50, %52 : vector<16x8x16xf32>
    %cst_33 = arith.constant 0.000000e+00 : f32
    %54 = vector.broadcast %cst_33 : f32 to vector<16x8x16xf32>
    %55 = arith.maximumf %53, %54 : vector<16x8x16xf32>
    %56 = vector.shape_cast %55 : vector<16x8x16xf32> to vector<128x16xf32>
    %cst_34 = arith.constant dense<0.000000e+00> : vector<128x4xf32>
    %57 = tpu.matmul %56, %6, %cst_34 {dimension_numbers = #tpu.dot_dimension_numbers<[1], [0], [0], [1], [0, 0, 1, 1], [], []>} : vector<128x16xf32>, vector<16x4xf32>, vector<128x4xf32> -> vector<128x4xf32>
    %c0_35 = arith.constant 0 : index
    %c0_36 = arith.constant 0 : index
    %58 = vector.load %arg7[%c0_35, %c0_36] : memref<1x4xf32, #tpu.memory_space<vmem>>, vector<1x4xf32>
    %59 = vector.broadcast %58 : vector<1x4xf32> to vector<128x4xf32>
    %60 = arith.addf %57, %59 : vector<128x4xf32>
    %61 = vector.shape_cast %60 : vector<128x4xf32> to vector<16x8x4xf32>
    %c0_37 = arith.constant 0 : index
    %c0_38 = arith.constant 0 : index
    %c0_39 = arith.constant 0 : index
    %62 = vector.load %arg1[%c0_37, %c0_38, %c0_39] : memref<16x8x4xf32, #tpu.memory_space<vmem>>, vector<16x8x4xf32>
    %63 = arith.addf %62, %61 : vector<16x8x4xf32>
    %c0_40 = arith.constant 0 : index
    %c0_41 = arith.constant 0 : index
    %c0_42 = arith.constant 0 : index
    %64 = vector.load %arg8[%c0_40, %c0_41, %c0_42] : memref<16x8x4xf32, #tpu.memory_space<vmem>>, vector<16x8x4xf32>
    tpu.vector_store %arg8[%c0_40, %c0_41, %c0_42], %63 {strides = array<i32>} : memref<16x8x4xf32, #tpu.memory_space<vmem>>, vector<16x8x4xf32>,
    return
  }
  func.func @transform_0(%arg0: i32) -> (i32, i32, i32) {
    %c0_i32 = arith.constant 0 : i32
    %c0_i32_0 = arith.constant 0 : i32
    %c0_i32_1 = arith.constant 0 : i32
    return %c0_i32, %arg0, %c0_i32_0 : i32, i32, i32
  }
  func.func @transform_1(%arg0: i32) -> (i32, i32) {
    %c0_i32 = arith.constant 0 : i32
    %c0_i32_0 = arith.constant 0 : i32
    %c0_i32_1 = arith.constant 0 : i32
    return %c0_i32, %c0_i32_0 : i32, i32
  }
  func.func @transform_2(%arg0: i32) -> (i32, i32) {
    %c0_i32 = arith.constant 0 : i32
    %c0_i32_0 = arith.constant 0 : i32
    %c0_i32_1 = arith.constant 0 : i32
    return %c0_i32, %c0_i32_0 : i32, i32
  }
  func.func @transform_3(%arg0: i32) -> (i32, i32) {
    %c0_i32 = arith.constant 0 : i32
    %c0_i32_0 = arith.constant 0 : i32
    %c0_i32_1 = arith.constant 0 : i32
    return %c0_i32, %c0_i32_0 : i32, i32
  }
  func.func @transform_4(%arg0: i32) -> (i32, i32) {
    %c0_i32 = arith.constant 0 : i32
    %c0_i32_0 = arith.constant 0 : i32
    %c0_i32_1 = arith.constant 0 : i32
    return %c0_i32, %c0_i32_0 : i32, i32
  }
  func.func @transform_5(%arg0: i32) -> (i32, i32) {
    %c0_i32 = arith.constant 0 : i32
    %c0_i32_0 = arith.constant 0 : i32
    %c0_i32_1 = arith.constant 0 : i32
    return %c0_i32, %c0_i32_0 : i32, i32
  }
  func.func @transform_6(%arg0: i32) -> (i32, i32) {
    %c0_i32 = arith.constant 0 : i32
    %c0_i32_0 = arith.constant 0 : i32
    %c0_i32_1 = arith.constant 0 : i32
    return %c0_i32, %c0_i32_0 : i32, i32
  }
  func.func @transform_7(%arg0: i32) -> (i32, i32, i32) {
    %c0_i32 = arith.constant 0 : i32
    %c0_i32_0 = arith.constant 0 : i32
    %c0_i32_1 = arith.constant 0 : i32
    return %c0_i32, %arg0, %c0_i32_0 : i32, i32, i32
  }
}

</mosaic_0001>

<bundles_post_ra>
// kernel: inverted_residual.1
= control target key start
LH: loop header
LB: loop body
LE: loop exit
PB: predicated region body
PF: predicated region fallthrough
CT: control target
= control target key end

     0   :  { %s1552_s24 = smov 0   ;;  %s1554_s25 = smov 0   ;;  %s1979_s0 = inlined_call_operand.vmem [shape: f32[16,32,4], index: 0, kind: input, shape index: {}]   ;;  %s1980_s1 = inlined_call_operand.vmem [shape: f32[4,16], index: 1, kind: input, shape index: {}]   ;;  %s1981_s2 = inlined_call_operand.vmem [shape: f32[1,16], index: 2, kind: input, shape index: {}]   ;;  %s1982_s3 = inlined_call_operand.vmem [shape: f32[5,16], index: 3, kind: input, shape index: {}]   ;;  %s1983_s4 = inlined_call_operand.vmem [shape: f32[1,16], index: 4, kind: input, shape index: {}]   ;;  %s1984_s5 = inlined_call_operand.vmem [shape: f32[16,4], index: 5, kind: input, shape index: {}]   ;;  %s1985_s6 = inlined_call_operand.vmem [shape: f32[1,4], index: 6, kind: input, shape index: {}]   ;;  %s1986_s7 = inlined_call_operand.vmem [shape: f32[16,32,4], index: 7, kind: output, shape index: {}]  }
   0x1   :  { %s1556_s26 = smov 0  }
   0x2 LB: > { %s1324_s27 = sadd.s32 4294967295, %s1509_s26   ;;  %s1569_s28 = sadd.s32 1, %s1509_s26   ;;  %s1509_s26 = sphi %s1556_s26, %s1990_s26   ;;  %s1505_s25 = sphi %s1554_s25, %s1989_s25   ;;  %s1501_s24 = sphi %s1552_s24, %s1988_s24  }
   0x3   : > { %s21_s29 = ssub.s32 %s1509_s26, %s1569_s28  ;;  %s24_s30 = sadd.s32 1, %s1505_s25 }
   0x4   : > { %p22_p0 = scmp.eq.s32.totalorder %s21_s29, 0  ;;  %p31_p1 = scmp.ne.s32.totalorder %s1505_s25, %s1501_s24 }
   0x5   : > { %p32_p2 = scmp.eq.s32.totalorder %s1509_s26, 0  ;;  %p187_p3 = scmp.eq.s32.totalorder %s1324_s27, 3 }
   0x6   : > { %s1580_s8 = scalar_select %p22_p0, %s1505_s25, %s24_s30  }
   0x7   : > { %p33_p4 = por %p32_p2, %p31_p1  ;;  %p1582_p5 = por %p187_p3, %p31_p1 }
   0x8   : > { %p1327_p6 = scmp.ge.s32.totalorder %s1509_s26, 4 }
   0xa   : > { %227 = sbr.rel (%p1327_p6) target bundleno = 35 (0x23), region = 40 }
   0xf   : > { %230 = sbr.rel (!%p33_p4) target bundleno = 35 (0x23), region = 44  ;;  %s232_s10 = sand.u32 (%p33_p4), 1, %s1505_s25  }
  0x10   : > { %s1329_s11 = sshll.u32 (%p33_p4), %s1509_s26, 3  ;;  %s1328_s12 = sshll.u32 (%p33_p4), %s232_s10, 7 }
  0x11   : > { %s1592_s15 = scalar_lea.vmem (%p33_p4), %s1979_s0, %s1329_s11  ;;  %s234_s16 = scalar_lea.vmem (%p33_p4), [#allocation3], %s1328_s12 }
  0x12   : > { %v295_v0 = vld [vmem:[%s1592_s15] sm:$0xff] (%p33_p4) }
  0x13   : > { %v297_v1 = vld [vmem:[%s1592_s15 + $0x20] sm:$0xff] (%p33_p4)  ;;  %296 = vst [vmem:[%s234_s16] sm:$0xff] (%p33_p4), %v295_v0 }
  0x14   : > { %v299_v2 = vld [vmem:[%s1592_s15 + $0x40] sm:$0xff]  ;;  %298 = vst [vmem:[%s234_s16 + $0x8] sm:$0xff] %v297_v1 }
  0x15   : > { %300 = vst [vmem:[%s234_s16 + $0x10] sm:$0xff] %v299_v2  ;;  %v301_v3 = vld [vmem:[%s1592_s15 + $0x60] sm:$0xff] }
  0x16   : > { %v303_v4 = vld [vmem:[%s1592_s15 + $0x80] sm:$0xff]  ;;  %302 = vst [vmem:[%s234_s16 + $0x18] sm:$0xff] %v301_v3 }
  0x17   : > { %v305_v5 = vld [vmem:[%s1592_s15 + $0xa0] sm:$0xff]  ;;  %304 = vst [vmem:[%s234_s16 + $0x20] sm:$0xff] %v303_v4 }
  0x18   : > { %306 = vst [vmem:[%s234_s16 + $0x28] sm:$0xff] %v305_v5  ;;  %v307_v6 = vld [vmem:[%s1592_s15 + $0xc0] sm:$0xff] }
  0x19   : > { %v309_v7 = vld [vmem:[%s1592_s15 + $0xe0] sm:$0xff]  ;;  %308 = vst [vmem:[%s234_s16 + $0x30] sm:$0xff] %v307_v6 }
  0x1a   : > { %v311_v8 = vld [vmem:[%s1592_s15 + $0x100] sm:$0xff]  ;;  %310 = vst [vmem:[%s234_s16 + $0x38] sm:$0xff] %v309_v7 }
  0x1b   : > { %312 = vst [vmem:[%s234_s16 + $0x40] sm:$0xff] %v311_v8  ;;  %v313_v9 = vld [vmem:[%s1592_s15 + $0x120] sm:$0xff] }
  0x1c   : > { %v315_v10 = vld [vmem:[%s1592_s15 + $0x140] sm:$0xff]  ;;  %314 = vst [vmem:[%s234_s16 + $0x48] sm:$0xff] %v313_v9 }
  0x1d   : > { %v317_v11 = vld [vmem:[%s1592_s15 + $0x160] sm:$0xff]  ;;  %316 = vst [vmem:[%s234_s16 + $0x50] sm:$0xff] %v315_v10 }
  0x1e   : > { %318 = vst [vmem:[%s234_s16 + $0x58] sm:$0xff] %v317_v11  ;;  %v319_v12 = vld [vmem:[%s1592_s15 + $0x180] sm:$0xff] }
  0x1f   : > { %v321_v13 = vld [vmem:[%s1592_s15 + $0x1a0] sm:$0xff]  ;;  %320 = vst [vmem:[%s234_s16 + $0x60] sm:$0xff] %v319_v12 }
  0x20   : > { %v323_v14 = vld [vmem:[%s1592_s15 + $0x1c0] sm:$0xff]  ;;  %322 = vst [vmem:[%s234_s16 + $0x68] sm:$0xff] %v321_v13 }
  0x21   : > { %324 = vst [vmem:[%s234_s16 + $0x70] sm:$0xff] %v323_v14  ;;  %v325_v15 = vld [vmem:[%s1592_s15 + $0x1e0] sm:$0xff] }
  0x22   : > { %326 = vst [vmem:[%s234_s16 + $0x78] sm:$0xff] %v325_v15 }
  0x23 PF: > { %p1330_p7 = scmp.ge.s32.totalorder %s1509_s26, 1  ;;  %p331_p8 = scmp.lt.s32.totalorder %s1509_s26, 5 }
  0x25   : > { %p332_p9 = pnand %p1330_p7, %p331_p8 }
  0x26   : > { %s338_s19 = sand.u32 (!%p332_p9), 1, %s1501_s24  }
  0x27   : > { %335 = sbr.rel (%p332_p9) target bundleno = 517 (0x205), region = 82  ;;  %s1616_s20 = sshll.u32 (!%p332_p9), %s338_s19, 7 }
  0x28   : > { %s1619_s21 = scalar_lea.vmem (!%p332_p9), [#allocation3], %s1616_s20  ;;  %s1897_s17 = scalar_lea.vmem (!%p332_p9), [#allocation4], %s1616_s20 }
  0x2c   : > { %v390_v16 = vld [vmem:[%s1980_s1] sm:$0xf]  ;;  %vm451_vm0 = vcmask 1043456   ;;  %vm402_vm1 = vcmask 31744   ;;  %v1625_v18 = vld [vmem:[%s1619_s21 + $0x8] sm:$0xff]  ;;  %v1628_v19 = vld [vmem:[%s1619_s21 + $0x10] sm:$0xff]  ;;  %v649_v36 = vlaneseq }
  0x2d   : > { %1408 = vmatprep.subr.msk.mxu0 %vm451_vm0, %v390_v16  ;;  %v1622_v17 = vld [vmem:[%s1619_s21] sm:$0xff]  ;;  %v1637_v20 = vld [vmem:[%s1619_s21 + $0x18] sm:$0xff]  ;;  %v1647_v22 = vld [vmem:[%s1619_s21 + $0x28] sm:$0xff]  ;;  %vm368_vm2 = vcmask 130048   ;;  %v1511_v33 = vmov 0.0   ;;  %s1370_s18 = sshll.u32 (%p1582_p5), %s1324_s27, 3 }
  0x2e   : > { %1409 = vmatpush3.msk.msra.mxu0 %vm451_vm0, %v390_v16  ;;  %1410 = vmatprep.mubr.msk.f32.mxu0 %vm402_vm1, %v1622_v17  ;;  %v1640_v21 = vld [vmem:[%s1619_s21 + $0x20] sm:$0xff]  ;;  %v1650_v23 = vld [vmem:[%s1619_s21 + $0x30] sm:$0xff]  ;;  %v1657_v24 = vld [vmem:[%s1619_s21 + $0x38] sm:$0xff]  ;;  %369 = vst.msk [vmem:[#allocation2] sm:$0xff] %vm368_vm2, %v1511_v33  ;;  %v650_v37 = vshrl.u32 %v649_v36, 7  ;;  %s1174_s9 = scalar_lea.vmem (%p1582_p5), %s1986_s7, %s1370_s18 }
  0x2f   : > { %1411 = vmatmul.mubr.msk.f32.vlgmr.msra.gmra.mxu0 %vm402_vm1, %v1625_v18  ;;  %v1660_v25 = vld [vmem:[%s1619_s21 + $0x40] sm:$0xff]  ;;  %v1667_v26 = vld [vmem:[%s1619_s21 + $0x48] sm:$0xff]  ;;  %v1670_v27 = vld [vmem:[%s1619_s21 + $0x50] sm:$0xff]  ;;  %370 = vst.msk [vmem:[#allocation2 + $0x8] sm:$0xff] %vm368_vm2, %v1511_v33 }
  0x30   : > { %1413 = vmatprep.mubr.msk.f32.mxu0 %vm402_vm1, %v1628_v19  ;;  %v1677_v28 = vld [vmem:[%s1619_s21 + $0x58] sm:$0xff]  ;;  %v1680_v29 = vld [vmem:[%s1619_s21 + $0x60] sm:$0xff]  ;;  %v1687_v30 = vld [vmem:[%s1619_s21 + $0x68] sm:$0xff]  ;;  %372 = vst.msk [vmem:[#allocation2 + $0x90] sm:$0xff] %vm368_vm2, %v1511_v33  ;;  %v651_v41 = vsub.s32 0, %v650_v37  ;;  %v688_v42 = vsub.s32 1, %v650_v37 }
  0x31   : > { %v1690_v31 = vld [vmem:[%s1619_s21 + $0x70] sm:$0xff]  ;;  %v1697_v32 = vld [vmem:[%s1619_s21 + $0x78] sm:$0xff]  ;;  %373 = vst.msk [vmem:[#allocation2 + $0x98] sm:$0xff] %vm368_vm2, %v1511_v33  ;;  %v392_v34 = vld [vmem:[%s1984_s5 + $0x8] sm:$0xff]  ;;  %v793_v55 = vsub.s32 3, %v650_v37  ;;  %v740_v59 = vsub.s32 2, %v650_v37 }
  0x32   : > { %1434 = vmatprep.subr.mxu1 %v392_v34  ;;  %v391_v35 = vld [vmem:[%s1984_s5] sm:$0xff]  ;;  %v846_v2 = vsub.s32 4, %v650_v37 }
  0x33   : > { %1414 = vmatmul.mubr.msk.f32.gmra.mxu0 %vm402_vm1, %v1637_v20  ;;  %1435 = vmatpush3.msra.mxu1 %v392_v34  ;;  %v1714_v38 = vld [vmem:[%s1981_s2] ss:$0 sm:$0xff] }
  0x34   : > { %1416 = vmatprep.mubr.msk.f32.mxu0 %vm402_vm1, %v1640_v21  ;;  %1436 = vmatprep.subr.mxu1 %v391_v35  ;;  %v395_v44 = vld [vmem:[%s1982_s3] sm:$0x1f] }
  0x35   : > { %1437 = vmatpush3.msra.mxu1 %v391_v35  ;;  %v1723_v50 = vrot.slane %v395_v44, %v651_v41  ;;  %v1725_v51 = vrot.slane %v395_v44, %v688_v42  ;;  %v633_v53 = vld [vmem:[#allocation2] sm:$0xff]  ;;  %v1733_v1 = vrot.slane %v395_v44, %v793_v55  ;;  %v1737_v6 = vrot.slane %v395_v44, %v740_v59 }
  0x36   : > { %v670_v54 = vld [vmem:[#allocation2 + $0x8] sm:$0xff]  ;;  %v1743_v15 = vrot.slane %v395_v44, %v846_v2 }
  0x37   : > { %1417 = vmatmul.mubr.msk.f32.gmra.mxu0 %vm402_vm1, %v1647_v22  ;;  %v653_v62 = vmul.f32 %v1723_v50, %v633_v53  ;;  %v690_v63 = vmul.f32 %v1725_v51, %v670_v54  ;;  %v654_v11 = vmul.f32 %v670_v54, %v1723_v50 }
  0x38   : > { %1419 = vmatprep.mubr.msk.f32.mxu0 %vm402_vm1, %v1650_v23 }
  0x39   : > { %v706_v10 = vadd.f32 %v690_v63, %v653_v62 }
  0x3b   : > { %1420 = vmatmul.mubr.msk.f32.gmra.mxu0 %vm402_vm1, %v1657_v24 }
  0x3c   : > { %1422 = vmatprep.mubr.msk.f32.mxu0 %vm402_vm1, %v1660_v25 }
  0x3f   : > { %1423 = vmatmul.mubr.msk.f32.gmra.mxu0 %vm402_vm1, %v1667_v26 }
  0x40   : > { %1425 = vmatprep.mubr.msk.f32.mxu0 %vm402_vm1, %v1670_v27 }
  0x43   : > { %1426 = vmatmul.mubr.msk.f32.gmra.mxu0 %vm402_vm1, %v1677_v28 }
  0x44   : > { %1428 = vmatprep.mubr.msk.f32.mxu0 %vm402_vm1, %v1680_v29 }
  0x47   : > { %1429 = vmatmul.mubr.msk.f32.gmra.mxu0 %vm402_vm1, %v1687_v30 }
  0x48   : > { %1431 = vmatprep.mubr.msk.f32.mxu0 %vm402_vm1, %v1690_v31 }
  0x4b   : > { %1432 = vmatmul.mubr.msk.f32.gmra.mxu0 %vm402_vm1, %v1697_v32 }
  0xef   : > { %v1412_v39 = vpop.f32.mrf.mxu0 }
  0xf0   : > { %v527_v40 = vadd.f32 %v1412_v39, %v1714_v38 }
  0xf1   : > { %v521_v43 = vpop.f32.mrf.mxu0 }
  0xf2   : > { %v601_v45 = vmax.f32 %v527_v40, 0.0  ;;  %v522_v46 = vadd.f32 %v1714_v38, %v521_v43 }
  0xf3   : > { %v1415_v47 = vpop.f32.mrf.mxu0 }
  0xf4   : > { %618 = vst.msk [vmem:[#allocation2 + $0x18] sm:$0xff] %vm368_vm2, %v601_v45  ;;  %v600_v48 = vmax.f32 %v522_v46, 0.0  ;;  %v537_v49 = vadd.f32 %v1415_v47, %v1714_v38 }
  0xf5   : > { %v531_v52 = vpop.f32.mrf.mxu0 }
  0xf6   : > { %617 = vst.msk [vmem:[#allocation2 + $0x10] sm:$0xff] %vm368_vm2, %v600_v48  ;;  %v603_v56 = vmax.f32 %v537_v49, 0.0  ;;  %v532_v57 = vadd.f32 %v1714_v38, %v531_v52 }
  0xf7   : > { %v1418_v58 = vpop.f32.mrf.mxu0 }
  0xf8   : > { %620 = vst.msk [vmem:[#allocation2 + $0x28] sm:$0xff] %vm368_vm2, %v603_v56  ;;  %v602_v60 = vmax.f32 %v532_v57, 0.0  ;;  %v547_v61 = vadd.f32 %v1418_v58, %v1714_v38 }
  0xf9   : > { %v541_v0 = vpop.f32.mrf.mxu0 }
  0xfa   : > { %619 = vst.msk [vmem:[#allocation2 + $0x20] sm:$0xff] %vm368_vm2, %v602_v60  ;;  %v605_v3 = vmax.f32 %v547_v61, 0.0  ;;  %v542_v4 = vadd.f32 %v1714_v38, %v541_v0  ;;  %v1769_v60 = vld [vmem:[%s1983_s4] ss:$0 sm:$0xff] }
  0xfb   : > { %v1421_v5 = vpop.f32.mrf.mxu0  ;;  %v775_v7 = vld [vmem:[#allocation2 + $0x18] sm:$0xff] }
  0xfc   : > { %622 = vst.msk [vmem:[#allocation2 + $0x38] sm:$0xff] %vm368_vm2, %v605_v3  ;;  %v604_v8 = vmax.f32 %v542_v4, 0.0  ;;  %v557_v9 = vadd.f32 %v1421_v5, %v1714_v38  ;;  %v795_v14 = vmul.f32 %v1733_v1, %v775_v7  ;;  %v743_v37 = vmul.f32 %v775_v7, %v1737_v6 }
  0xfd   : > { %v551_v12 = vpop.f32.mrf.mxu0  ;;  %v722_v13 = vld [vmem:[#allocation2 + $0x10] sm:$0xff]  ;;  %v692_v41 = vmul.f32 %v775_v7, %v1725_v51  ;;  %v656_v42 = vmul.f32 %v775_v7, %v1723_v50 }
  0xfe   : > { %621 = vst.msk [vmem:[#allocation2 + $0x30] sm:$0xff] %vm368_vm2, %v604_v8  ;;  %v607_v16 = vmax.f32 %v557_v9, 0.0  ;;  %v552_v33 = vadd.f32 %v1714_v38, %v551_v12  ;;  %v742_v34 = vmul.f32 %v1737_v6, %v722_v13  ;;  %v691_v35 = vmul.f32 %v722_v13, %v1725_v51 }
  0xff   : > { %v1424_v36 = vpop.f32.mrf.mxu0  ;;  %v1750_v39 = vld [vmem:[#allocation2 + $0x28] sm:$0xff]  ;;  %v655_v40 = vmul.f32 %v722_v13, %v1723_v50 }
 0x100   : > { %624 = vst.msk [vmem:[#allocation2 + $0x48] sm:$0xff] %vm368_vm2, %v607_v16  ;;  %v606_v43 = vmax.f32 %v552_v33, 0.0  ;;  %v567_v44 = vadd.f32 %v1424_v36, %v1714_v38  ;;  %v758_v45 = vadd.f32 %v742_v34, %v706_v10  ;;  %v707_v46 = vadd.f32 %v691_v35, %v654_v11 }
 0x101   : > { %v561_v47 = vpop.f32.mrf.mxu0  ;;  %v828_v48 = vld [vmem:[#allocation2 + $0x20] sm:$0xff]  ;;  %v849_v49 = vmul.f32 %v1743_v15, %v1750_v39  ;;  %v708_v52 = vadd.f32 %v692_v41, %v655_v40  ;;  %v797_v53 = vmul.f32 %v1750_v39, %v1733_v1  ;;  %v745_v54 = vmul.f32 %v1750_v39, %v1737_v6 }
 0x102   : > { %623 = vst.msk [vmem:[#allocation2 + $0x40] sm:$0xff] %vm368_vm2, %v606_v43  ;;  %v609_v55 = vmax.f32 %v567_v44, 0.0  ;;  %v562_v56 = vadd.f32 %v1714_v38, %v561_v47  ;;  %v811_v57 = vadd.f32 %v795_v14, %v758_v45  ;;  %v848_v58 = vmul.f32 %v1743_v15, %v828_v48 }
 0x103   : > { %v1427_v59 = vpop.f32.mrf.mxu0  ;;  %v759_v61 = vadd.f32 %v743_v37, %v707_v46  ;;  %v796_v62 = vmul.f32 %v828_v48, %v1733_v1  ;;  %v744_v63 = vmul.f32 %v828_v48, %v1737_v6  ;;  %v693_v0 = vmul.f32 %v828_v48, %v1725_v51  ;;  %v1774_v2 = vld [vmem:[#allocation2 + $0x38] sm:$0xff] }
 0x104   : > { %626 = vst.msk [vmem:[#allocation2 + $0x58] sm:$0xff] %vm368_vm2, %v609_v55  ;;  %v608_v3 = vmax.f32 %v562_v56, 0.0  ;;  %v577_v4 = vadd.f32 %v1427_v59, %v1714_v38  ;;  %v864_v5 = vadd.f32 %v848_v58, %v811_v57  ;;  %v851_v7 = vmul.f32 %v1743_v15, %v1774_v2 }
 0x105   : > { %v571_v8 = vpop.f32.mrf.mxu0  ;;  %v812_v9 = vadd.f32 %v796_v62, %v759_v61  ;;  %v760_v10 = vadd.f32 %v744_v63, %v708_v52  ;;  %v830_v11 = vld [vmem:[#allocation2 + $0x30] sm:$0xff]  ;;  %v709_v12 = vadd.f32 %v693_v0, %v656_v42  ;;  %v657_v13 = vmul.f32 %v828_v48, %v1723_v50 }
 0x106   : > { %625 = vst.msk [vmem:[#allocation2 + $0x50] sm:$0xff] %vm368_vm2, %v608_v3  ;;  %v611_v14 = vmax.f32 %v577_v4, 0.0  ;;  %v572_v16 = vadd.f32 %v1714_v38, %v571_v8  ;;  %v886_v33 = vadd.f32 %v1769_v60, %v864_v5  ;;  %v850_v34 = vmul.f32 %v1743_v15, %v830_v11 }
 0x107   : > { %v1430_v35 = vpop.f32.mrf.mxu0  ;;  %v865_v36 = vadd.f32 %v849_v49, %v812_v9  ;;  %v813_v37 = vadd.f32 %v797_v53, %v760_v10  ;;  %v761_v40 = vadd.f32 %v745_v54, %v709_v12  ;;  %v798_v41 = vmul.f32 %v830_v11, %v1733_v1 }
 0x108   : > { %628 = vst.msk [vmem:[#allocation2 + $0x68] sm:$0xff] %vm368_vm2, %v611_v14  ;;  %v610_v42 = vmax.f32 %v572_v16, 0.0  ;;  %v587_v43 = vadd.f32 %v1430_v35, %v1714_v38  ;;  %v902_v44 = vmax.f32 %v886_v33, 0.0  ;;  %v694_v45 = vmul.f32 %v1750_v39, %v1725_v51  ;;  %v833_v33 = vld [vmem:[#allocation2 + $0x48] sm:$0xff] }
 0x109   : > { %v581_v46 = vpop.f32.mrf.mxu0  ;;  %v887_v47 = vadd.f32 %v1769_v60, %v865_v36  ;;  %v866_v48 = vadd.f32 %v850_v34, %v813_v37  ;;  %v814_v52 = vadd.f32 %v798_v41, %v761_v40  ;;  %v746_v49 = vmul.f32 %v830_v11, %v1737_v6  ;;  %v832_v53 = vld [vmem:[#allocation2 + $0x40] sm:$0xff] }
 0x10a   : > { %627 = vst.msk [vmem:[#allocation2 + $0x60] sm:$0xff] %vm368_vm2, %v610_v42  ;;  %v613_v54 = vmax.f32 %v587_v43, 0.0  ;;  %v582_v55 = vadd.f32 %v1714_v38, %v581_v46  ;;  %1438 = vmatprep.mubr.msk.f32.mxu1 %vm368_vm2, %v902_v44  ;;  %v710_v56 = vadd.f32 %v694_v45, %v657_v13  ;;  %v799_v62 = vmul.f32 %v1774_v2, %v1733_v1 }
 0x10b   : > { %v1433_v57 = vpop.f32.mrf.mxu0  ;;  %v903_v58 = vmax.f32 %v887_v47, 0.0  ;;  %v888_v59 = vadd.f32 %v1769_v60, %v866_v48  ;;  %v867_v61 = vadd.f32 %v851_v7, %v814_v52  ;;  %v852_v4 = vmul.f32 %v1743_v15, %v832_v53 }
 0x10c   : > { %630 = vst.msk [vmem:[#allocation2 + $0x78] sm:$0xff] %vm368_vm2, %v613_v54  ;;  %v612_v63 = vmax.f32 %v582_v55, 0.0  ;;  %v597_v0 = vadd.f32 %v1433_v57, %v1714_v38  ;;  %v762_v3 = vadd.f32 %v746_v49, %v710_v56  ;;  %v658_v7 = vmul.f32 %v1750_v39, %v1723_v50  ;;  %v835_v49 = vld [vmem:[#allocation2 + $0x58] sm:$0xff] }
 0x10d   : > { %1439 = vmatmul.mubr.msk.f32.vlgmr.msra.gmra.mxu1 %vm368_vm2, %v903_v58  ;;  %v591_v5 = vpop.f32.mrf.mxu0  ;;  %v904_v8 = vmax.f32 %v888_v59, 0.0  ;;  %v889_v9 = vadd.f32 %v1769_v60, %v867_v61  ;;  %v695_v10 = vmul.f32 %v830_v11, %v1725_v51  ;;  %v747_v16 = vmul.f32 %v1774_v2, %v1737_v6  ;;  %v834_v34 = vld [vmem:[#allocation2 + $0x50] sm:$0xff] }
 0x10e   : > { %629 = vst.msk [vmem:[#allocation2 + $0x70] sm:$0xff] %vm368_vm2, %v612_v63  ;;  %v615_v12 = vmax.f32 %v597_v0, 0.0  ;;  %v592_v13 = vadd.f32 %v1714_v38, %v591_v5  ;;  %v815_v14 = vadd.f32 %v799_v62, %v762_v3  ;;  %v800_v37 = vmul.f32 %v832_v53, %v1733_v1 }
 0x10f   : > { %1441 = vmatprep.mubr.msk.f32.mxu1 %vm368_vm2, %v904_v8  ;;  %v905_v35 = vmax.f32 %v889_v9, 0.0  ;;  %v711_v36 = vadd.f32 %v695_v10, %v658_v7  ;;  %v659_v39 = vmul.f32 %v830_v11, %v1723_v50  ;;  %v696_v38 = vmul.f32 %v1774_v2, %v1725_v51 }
 0x110   : > { %632 = vst.msk [vmem:[#allocation2 + $0x88] sm:$0xff] %vm368_vm2, %v615_v12  ;;  %v614_v40 = vmax.f32 %v592_v13, 0.0  ;;  %v868_v41 = vadd.f32 %v852_v4, %v815_v14  ;;  %v748_v42 = vmul.f32 %v832_v53, %v1737_v6  ;;  %v853_v44 = vmul.f32 %v1743_v15, %v833_v33 }
 0x111   : > { %1442 = vmatmul.mubr.msk.f32.gmra.mxu1 %vm368_vm2, %v905_v35  ;;  %v763_v43 = vadd.f32 %v747_v16, %v711_v36  ;;  %v801_v45 = vmul.f32 %v833_v33, %v1733_v1  ;;  %v854_v46 = vmul.f32 %v1743_v15, %v834_v34  ;;  %v712_v47 = vadd.f32 %v696_v38, %v659_v39  ;;  %v836_v58 = vld [vmem:[#allocation2 + $0x60] sm:$0xff] }
 0x112   : > { %631 = vst.msk [vmem:[#allocation2 + $0x80] sm:$0xff] %vm368_vm2, %v614_v40  ;;  %v890_v11 = vadd.f32 %v1769_v60, %v868_v41  ;;  %v660_v48 = vmul.f32 %v1774_v2, %v1723_v50  ;;  %v697_v52 = vmul.f32 %v832_v53, %v1725_v51  ;;  %v749_v55 = vmul.f32 %v833_v33, %v1737_v6 }
 0x113   : > { %v816_v54 = vadd.f32 %v800_v37, %v763_v43  ;;  %v802_v56 = vmul.f32 %v834_v34, %v1733_v1  ;;  %v661_v57 = vmul.f32 %v832_v53, %v1723_v50  ;;  %v764_v61 = vadd.f32 %v748_v42, %v712_v47  ;;  %v837_v37 = vld [vmem:[#allocation2 + $0x68] sm:$0xff] }
 0x114   : > { %v906_v59 = vmax.f32 %v890_v11, 0.0  ;;  %v713_v62 = vadd.f32 %v697_v52, %v660_v48  ;;  %v698_v63 = vmul.f32 %v833_v33, %v1725_v51  ;;  %v855_v3 = vmul.f32 %v1743_v15, %v835_v49 }
 0x115   : > { %v869_v0 = vadd.f32 %v853_v44, %v816_v54  ;;  %v750_v2 = vmul.f32 %v834_v34, %v1737_v6  ;;  %v803_v4 = vmul.f32 %v835_v49, %v1733_v1  ;;  %v817_v5 = vadd.f32 %v801_v45, %v764_v61  ;;  %v838_v42 = vld [vmem:[#allocation2 + $0x70] sm:$0xff] }
 0x116   : > { %1444 = vmatprep.mubr.msk.f32.mxu1 %vm368_vm2, %v906_v59  ;;  %v765_v8 = vadd.f32 %v749_v55, %v713_v62  ;;  %v714_v9 = vadd.f32 %v698_v63, %v661_v57  ;;  %v856_v53 = vmul.f32 %v1743_v15, %v836_v58  ;;  %v662_v10 = vmul.f32 %v833_v33, %v1723_v50  ;;  %v839_v62 = vld [vmem:[#allocation2 + $0x78] sm:$0xff] }
 0x117   : > { %v891_v7 = vadd.f32 %v1769_v60, %v869_v0  ;;  %v699_v12 = vmul.f32 %v834_v34, %v1725_v51  ;;  %v751_v13 = vmul.f32 %v835_v49, %v1737_v6  ;;  %v870_v14 = vadd.f32 %v854_v46, %v817_v5 }
 0x118   : > { %v818_v16 = vadd.f32 %v802_v56, %v765_v8  ;;  %v766_v35 = vadd.f32 %v750_v2, %v714_v9  ;;  %v804_v36 = vmul.f32 %v836_v58, %v1733_v1  ;;  %v663_v41 = vmul.f32 %v834_v34, %v1723_v50 }
 0x119   : > { %v907_v39 = vmax.f32 %v891_v7, 0.0  ;;  %v715_v40 = vadd.f32 %v699_v12, %v662_v10  ;;  %v700_v38 = vmul.f32 %v835_v49, %v1725_v51  ;;  %v892_v43 = vadd.f32 %v1769_v60, %v870_v14 }
 0x11a   : > { %v871_v33 = vadd.f32 %v855_v3, %v818_v16  ;;  %v819_v44 = vadd.f32 %v803_v4, %v766_v35  ;;  %v752_v45 = vmul.f32 %v836_v58, %v1737_v6  ;;  %v857_v11 = vmul.f32 %v1743_v15, %v837_v37 }
 0x11b   : > { %1445 = vmatmul.mubr.msk.f32.gmra.mxu1 %vm368_vm2, %v907_v39  ;;  %v767_v46 = vadd.f32 %v751_v13, %v715_v40  ;;  %v716_v47 = vadd.f32 %v700_v38, %v663_v41  ;;  %v805_v48 = vmul.f32 %v837_v37, %v1733_v1  ;;  %v908_v52 = vmax.f32 %v892_v43, 0.0 }
 0x11c   : > { %v893_v34 = vadd.f32 %v1769_v60, %v871_v33  ;;  %v872_v54 = vadd.f32 %v856_v53, %v819_v44  ;;  %v858_v55 = vmul.f32 %v1743_v15, %v838_v42  ;;  %v664_v59 = vmul.f32 %v835_v49, %v1723_v50  ;;  %v840_v53 = vld [vmem:[#allocation2 + $0x80] sm:$0xff]  ;;  %v842_v44 = vld [vmem:[#allocation2 + $0x90] sm:$0xff] }
 0x11d   : > { %v820_v56 = vadd.f32 %v804_v36, %v767_v46  ;;  %v768_v57 = vadd.f32 %v752_v45, %v716_v47  ;;  %v701_v61 = vmul.f32 %v836_v58, %v1725_v51  ;;  %1447 = vmatprep.mubr.msk.f32.mxu1 %vm368_vm2, %v908_v52  ;;  %v753_v3 = vmul.f32 %v837_v37, %v1737_v6 }
 0x11e   : > { %v909_v63 = vmax.f32 %v893_v34, 0.0  ;;  %v894_v0 = vadd.f32 %v1769_v60, %v872_v54  ;;  %v806_v2 = vmul.f32 %v838_v42, %v1733_v1  ;;  %v665_v9 = vmul.f32 %v836_v58, %v1723_v50 }
 0x11f   : > { %v873_v4 = vadd.f32 %v857_v11, %v820_v56  ;;  %v821_v5 = vadd.f32 %v805_v48, %v768_v57  ;;  %v717_v8 = vadd.f32 %v701_v61, %v664_v59  ;;  %v859_v7 = vmul.f32 %v1743_v15, %v839_v62 }
 0x120   : > { %1448 = vmatmul.mubr.msk.f32.gmra.mxu1 %vm368_vm2, %v909_v63  ;;  %v910_v49 = vmax.f32 %v894_v0, 0.0  ;;  %v702_v10 = vmul.f32 %v837_v37, %v1725_v51  ;;  %v754_v12 = vmul.f32 %v838_v42, %v1737_v6  ;;  %v807_v35 = vmul.f32 %v839_v62, %v1733_v1 }
 0x121   : > { %v895_v13 = vadd.f32 %v1769_v60, %v873_v4  ;;  %v874_v14 = vadd.f32 %v858_v55, %v821_v5  ;;  %v769_v16 = vadd.f32 %v753_v3, %v717_v8  ;;  %v860_v58 = vmul.f32 %v1743_v15, %v840_v53  ;;  %v843_v8 = vld [vmem:[#allocation2 + $0x98] sm:$0xff] }
 0x122   : > { %1450 = vmatprep.mubr.msk.f32.mxu1 %vm368_vm2, %v910_v49  ;;  %v718_v36 = vadd.f32 %v702_v10, %v665_v9  ;;  %v666_v39 = vmul.f32 %v837_v37, %v1723_v50  ;;  %v703_v40 = vmul.f32 %v838_v42, %v1725_v51  ;;  %v755_v33 = vmul.f32 %v839_v62, %v1737_v6  ;;  %v841_v37 = vld [vmem:[#allocation2 + $0x88] sm:$0xff] }
 0x123   : > { %v911_v41 = vmax.f32 %v895_v13, 0.0  ;;  %v896_v38 = vadd.f32 %v1769_v60, %v874_v14  ;;  %v822_v43 = vadd.f32 %v806_v2, %v769_v16  ;;  %v808_v11 = vmul.f32 %v840_v53, %v1733_v1 }
 0x124   : > { %v770_v45 = vadd.f32 %v754_v12, %v718_v36  ;;  %v719_v46 = vadd.f32 %v703_v40, %v666_v39  ;;  %v667_v47 = vmul.f32 %v838_v42, %v1723_v50  ;;  %v704_v34 = vmul.f32 %v839_v62, %v1725_v51  ;;  %v1352_v40 = vld [vmem:[%s1985_s6] ss:$0 sm:$0xff] }
 0x125   : > { %1451 = vmatmul.mubr.msk.f32.gmra.mxu1 %vm368_vm2, %v911_v41  ;;  %v912_v48 = vmax.f32 %v896_v38, 0.0  ;;  %v875_v52 = vadd.f32 %v859_v7, %v822_v43  ;;  %v756_v54 = vmul.f32 %v840_v53, %v1737_v6  ;;  %v862_v57 = vmul.f32 %v1743_v15, %v842_v44 }
 0x126   : > { %v823_v55 = vadd.f32 %v807_v35, %v770_v45  ;;  %v771_v56 = vadd.f32 %v755_v33, %v719_v46  ;;  %v810_v59 = vmul.f32 %v842_v44, %v1733_v1  ;;  %v720_v42 = vadd.f32 %v704_v34, %v667_v47 }
 0x127   : > { %1453 = vmatprep.mubr.msk.f32.mxu1 %vm368_vm2, %v912_v48  ;;  %v897_v61 = vadd.f32 %v1769_v60, %v875_v52  ;;  %v668_v63 = vmul.f32 %v839_v62, %v1723_v50  ;;  %v705_v0 = vmul.f32 %v840_v53, %v1725_v51  ;;  %v861_v4 = vmul.f32 %v1743_v15, %v841_v37 }
 0x128   : > { %v876_v3 = vadd.f32 %v860_v58, %v823_v55  ;;  %v824_v2 = vadd.f32 %v808_v11, %v771_v56  ;;  %v809_v5 = vmul.f32 %v841_v37, %v1733_v1  ;;  %v772_v49 = vadd.f32 %v756_v54, %v720_v42 }
 0x129   : > { %v913_v9 = vmax.f32 %v897_v61, 0.0  ;;  %v721_v7 = vadd.f32 %v705_v0, %v668_v63  ;;  %v757_v10 = vmul.f32 %v841_v37, %v1737_v6  ;;  %v863_v51 = vmul.f32 %v1743_v15, %v843_v8 }
 0x12a   : > { %v898_v12 = vadd.f32 %v1769_v60, %v876_v3  ;;  %v877_v13 = vadd.f32 %v861_v4, %v824_v2  ;;  %v825_v50 = vadd.f32 %v809_v5, %v772_v49 }
 0x12b   : > { %1454 = vmatmul.mubr.msk.f32.gmra.mxu1 %vm368_vm2, %v913_v9  ;;  %v773_v62 = vadd.f32 %v757_v10, %v721_v7 }
 0x12c   : > { %v914_v53 = vmax.f32 %v898_v12, 0.0  ;;  %v899_v14 = vadd.f32 %v1769_v60, %v877_v13  ;;  %v878_v16 = vadd.f32 %v862_v57, %v825_v50 }
 0x12d   : > { %v826_v1 = vadd.f32 %v810_v59, %v773_v62 }
 0x12e   : > { %1456 = vmatprep.mubr.msk.f32.mxu1 %vm368_vm2, %v914_v53  ;;  %v915_v35 = vmax.f32 %v899_v14, 0.0  ;;  %v900_v6 = vadd.f32 %v1769_v60, %v878_v16 }
 0x12f   : > { %v879_v36 = vadd.f32 %v863_v51, %v826_v1 }
 0x130   : > { %1457 = vmatmul.mubr.msk.f32.gmra.mxu1 %vm368_vm2, %v915_v35  ;;  %v916_v58 = vmax.f32 %v900_v6, 0.0 }
 0x131   : > { %v901_v39 = vadd.f32 %v1769_v60, %v879_v36 }
 0x132   : > { %1459 = vmatprep.mubr.msk.f32.mxu1 %vm368_vm2, %v916_v58 }
 0x133   : > { %v917_v15 = vmax.f32 %v901_v39, 0.0 }
 0x135   : > { %1460 = vmatmul.mubr.msk.f32.gmra.mxu1 %vm368_vm2, %v917_v15 }
 0x1cd   : > { %v1440_v41 = vpop.f32.mrf.mxu1 }
 0x1ce   : > { %v1045_v38 = vadd.f32 %v1440_v41, %v1352_v40 }
 0x1cf   : > { %v1039_v43 = vpop.f32.mrf.mxu1 }
 0x1d0   : > { %v1135_v33 = vadd.f32 %v1045_v38, %v1625_v18  ;;  %v1040_v44 = vadd.f32 %v1352_v40, %v1039_v43 }
 0x1d1   : > { %v1443_v45 = vpop.f32.mrf.mxu1 }
 0x1d2   : > { %1151 = vst.msk [vmem:[%s1897_s17 + $0x8] sm:$0xff] %vm402_vm1, %v1135_v33  ;;  %v1134_v60 = vadd.f32 %v1040_v44, %v1622_v17  ;;  %v1055_v46 = vadd.f32 %v1443_v45, %v1352_v40 }
 0x1d3   : > { %v1049_v11 = vpop.f32.mrf.mxu1 }
 0x1d4   : > { %1150 = vst.msk [vmem:[%s1897_s17] sm:$0xff] %vm402_vm1, %v1134_v60  ;;  %v1137_v18 = vadd.f32 %v1055_v46, %v1637_v20  ;;  %v1050_v47 = vadd.f32 %v1352_v40, %v1049_v11 }
 0x1d6   : > { %1153 = vst.msk [vmem:[%s1897_s17 + $0x18] sm:$0xff] %vm402_vm1, %v1137_v18  ;;  %v1136_v48 = vadd.f32 %v1050_v47, %v1628_v19 }
 0x1d8   : > { %1152 = vst.msk [vmem:[%s1897_s17 + $0x10] sm:$0xff] %vm402_vm1, %v1136_v48 }
 0x1db   : > { %v1446_v52 = vpop.f32.mrf.mxu1 }
 0x1dc   : > { %v1065_v37 = vadd.f32 %v1446_v52, %v1352_v40 }
 0x1dd   : > { %v1059_v34 = vpop.f32.mrf.mxu1 }
 0x1de   : > { %v1139_v17 = vadd.f32 %v1065_v37, %v1647_v22  ;;  %v1060_v54 = vadd.f32 %v1352_v40, %v1059_v34 }
 0x1e0   : > { %1155 = vst.msk [vmem:[%s1897_s17 + $0x28] sm:$0xff] %vm402_vm1, %v1139_v17  ;;  %v1138_v20 = vadd.f32 %v1060_v54, %v1640_v21  ;;  %v1449_v55 = vpop.f32.mrf.mxu1 }
 0x1e1   : > { %v1075_v56 = vadd.f32 %v1449_v55, %v1352_v40 }
 0x1e2   : > { %1154 = vst.msk [vmem:[%s1897_s17 + $0x20] sm:$0xff] %vm402_vm1, %v1138_v20  ;;  %v1069_v19 = vpop.f32.mrf.mxu1 }
 0x1e3   : > { %v1141_v57 = vadd.f32 %v1075_v56, %v1657_v24  ;;  %v1070_v59 = vadd.f32 %v1352_v40, %v1069_v19 }
 0x1e5   : > { %1157 = vst.msk [vmem:[%s1897_s17 + $0x38] sm:$0xff] %vm402_vm1, %v1141_v57  ;;  %v1140_v22 = vadd.f32 %v1070_v59, %v1650_v23  ;;  %v1452_v61 = vpop.f32.mrf.mxu1 }
 0x1e6   : > { %v1085_v42 = vadd.f32 %v1452_v61, %v1352_v40 }
 0x1e7   : > { %1156 = vst.msk [vmem:[%s1897_s17 + $0x30] sm:$0xff] %vm402_vm1, %v1140_v22  ;;  %v1079_v21 = vpop.f32.mrf.mxu1  ;;  %v1243_v53 = vld [vmem:[%s1897_s17 + $0x28] sm:$0xff] (%p1582_p5) }
 0x1e8   : > { %v1143_v63 = vadd.f32 %v1085_v42, %v1667_v26  ;;  %v1080_v0 = vadd.f32 %v1352_v40, %v1079_v21  ;;  %1244 = vst [vmem:[%s1174_s9 + $0xa0] sm:$0xff] (%p1582_p5), %v1243_v53 }
 0x1e9   : > { %v1241_v51 = vld [vmem:[%s1897_s17 + $0x20] sm:$0xff] (%p1582_p5) }
 0x1ea   : > { %1159 = vst.msk [vmem:[%s1897_s17 + $0x48] sm:$0xff] %vm402_vm1, %v1143_v63  ;;  %v1142_v24 = vadd.f32 %v1080_v0, %v1660_v25  ;;  %1242 = vst [vmem:[%s1174_s9 + $0x80] sm:$0xff] (%p1582_p5), %v1241_v51 }
 0x1eb   : > { %v1455_v3 = vpop.f32.mrf.mxu1 }
 0x1ec   : > { %1158 = vst.msk [vmem:[%s1897_s17 + $0x40] sm:$0xff] %vm402_vm1, %v1142_v24  ;;  %v1095_v2 = vadd.f32 %v1455_v3, %v1352_v40  ;;  %v1247_v16 = vld [vmem:[%s1897_s17 + $0x38] sm:$0xff] (%p1582_p5) }
 0x1ed   : > { %v1089_v23 = vpop.f32.mrf.mxu1  ;;  %1248 = vst [vmem:[%s1174_s9 + $0xe0] sm:$0xff] (%p1582_p5), %v1247_v16 }
 0x1ee   : > { %v1145_v4 = vadd.f32 %v1095_v2, %v1677_v28  ;;  %v1090_v5 = vadd.f32 %v1352_v40, %v1089_v23  ;;  %v1245_v14 = vld [vmem:[%s1897_s17 + $0x30] sm:$0xff] (%p1582_p5) }
 0x1ef   : > { %1246 = vst [vmem:[%s1174_s9 + $0xc0] sm:$0xff] (%p1582_p5), %v1245_v14 }
 0x1f0   : > { %1161 = vst.msk [vmem:[%s1897_s17 + $0x58] sm:$0xff] %vm402_vm1, %v1145_v4  ;;  %v1144_v26 = vadd.f32 %v1090_v5, %v1670_v27  ;;  %v1458_v8 = vpop.f32.mrf.mxu1 }
 0x1f1   : > { %v1105_v9 = vadd.f32 %v1458_v8, %v1352_v40  ;;  %v1251_v35 = vld [vmem:[%s1897_s17 + $0x48] sm:$0xff] (%p1582_p5) }
 0x1f2   : > { %1160 = vst.msk [vmem:[%s1897_s17 + $0x50] sm:$0xff] %vm402_vm1, %v1144_v26  ;;  %v1099_v25 = vpop.f32.mrf.mxu1  ;;  %1252 = vst [vmem:[%s1174_s9 + $0x120] sm:$0xff] (%p1582_p5), %v1251_v35 }
 0x1f3   : > { %v1147_v49 = vadd.f32 %v1105_v9, %v1687_v30  ;;  %v1100_v7 = vadd.f32 %v1352_v40, %v1099_v25  ;;  %v1235_v30 = vld [vmem:[%s1897_s17 + $0x8] sm:$0xff] (%p1582_p5)  ;;  %v1249_v1 = vld [vmem:[%s1897_s17 + $0x40] sm:$0xff] (%p1582_p5) }
 0x1f4   : > { %1236 = vst [vmem:[%s1174_s9 + $0x20] sm:$0xff] (%p1582_p5), %v1235_v30  ;;  %1250 = vst [vmem:[%s1174_s9 + $0x100] sm:$0xff] (%p1582_p5), %v1249_v1 }
 0x1f5   : > { %1163 = vst.msk [vmem:[%s1897_s17 + $0x68] sm:$0xff] %vm402_vm1, %v1147_v49  ;;  %v1146_v10 = vadd.f32 %v1100_v7, %v1680_v29  ;;  %v1461_v28 = vpop.f32.mrf.mxu1  ;;  %v1233_v29 = vld [vmem:[%s1897_s17] sm:$0xff] (%p1582_p5) }
 0x1f6   : > { %v1115_v12 = vadd.f32 %v1461_v28, %v1352_v40  ;;  %1234 = vst [vmem:[%s1174_s9] sm:$0xff] (%p1582_p5), %v1233_v29 }
 0x1f7   : > { %1162 = vst.msk [vmem:[%s1897_s17 + $0x60] sm:$0xff] %vm402_vm1, %v1146_v10  ;;  %v1109_v13 = vpop.f32.mrf.mxu1  ;;  %v1255_v36 = vld [vmem:[%s1897_s17 + $0x58] sm:$0xff] (%p1582_p5) }
 0x1f8   : > { %v1149_v27 = vadd.f32 %v1115_v12, %v1697_v32  ;;  %v1110_v50 = vadd.f32 %v1352_v40, %v1109_v13  ;;  %1172 = sbr.rel (!%p1582_p5) target bundleno = 517 (0x205), region = 90  ;;  %v1239_v32 = vld [vmem:[%s1897_s17 + $0x18] sm:$0xff] (%p1582_p5)  ;;  %1256 = vst [vmem:[%s1174_s9 + $0x160] sm:$0xff] (%p1582_p5), %v1255_v36 }
 0x1f9   : > { %1240 = vst [vmem:[%s1174_s9 + $0x60] sm:$0xff] (%p1582_p5), %v1239_v32  ;;  %v1253_v6 = vld [vmem:[%s1897_s17 + $0x50] sm:$0xff] (%p1582_p5) }
 0x1fa   : > { %1165 = vst.msk [vmem:[%s1897_s17 + $0x78] sm:$0xff] %vm402_vm1, %v1149_v27  ;;  %v1148_v62 = vadd.f32 %v1110_v50, %v1690_v31  ;;  %v1237_v31 = vld [vmem:[%s1897_s17 + $0x10] sm:$0xff] (%p1582_p5)  ;;  %1254 = vst [vmem:[%s1174_s9 + $0x140] sm:$0xff] (%p1582_p5), %v1253_v6 }
 0x1fb   : > { %1238 = vst [vmem:[%s1174_s9 + $0x40] sm:$0xff] (%p1582_p5), %v1237_v31 }
 0x1fc   : > { %1164 = vst.msk [vmem:[%s1897_s17 + $0x70] sm:$0xff] %vm402_vm1, %v1148_v62  ;;  %v1259_v39 = vld [vmem:[%s1897_s17 + $0x68] sm:$0xff] (%p1582_p5) }
 0x1fd   : > { %1260 = vst [vmem:[%s1174_s9 + $0x1a0] sm:$0xff] %v1259_v39 }
 0x1fe   : > { %v1257_v58 = vld [vmem:[%s1897_s17 + $0x60] sm:$0xff] }
 0x1ff   : > { %1258 = vst [vmem:[%s1174_s9 + $0x180] sm:$0xff] %v1257_v58 }
 0x201   : > { %v1263_v40 = vld [vmem:[%s1897_s17 + $0x78] sm:$0xff] }
 0x202   : > { %1264 = vst [vmem:[%s1174_s9 + $0x1e0] sm:$0xff] %v1263_v40 }
 0x203   : > { %v1261_v15 = vld [vmem:[%s1897_s17 + $0x70] sm:$0xff] }
 0x204   : > { %1262 = vst [vmem:[%s1174_s9 + $0x1c0] sm:$0xff] %v1261_v15 }
 0x205 PF: > { %p14_p10 = scmp.ge.s32.totalorder %s1569_s28, 6   ;;  %s1988_s24 = smov %s1505_s25 }
 0x206   : > { %s1989_s25 = smov %s1580_s8  ;;  %s1990_s26 = smov %s1569_s28 }
 0x207   :  { %16 = sbr.rel (!%p14_p10) target bundleno = 2 (0x2), region = 164 }

</bundles_post_ra>
